<compile_context>
chip_gen: v5e
topology: v5e:2x2
jax: 0.10.0
libtpu: 0.0.40
codegen_flags: <defaults>
</compile_context>

<pallas_src>
import functools

import jax
import jax.numpy as jnp
from jax.experimental import pallas as pl
from jax.experimental.pallas import tpu as pltpu


def _round_up(x, m):
    return ((x + m - 1) // m) * m


def _qa_fuzzy_loss_kernel(start_logits_ref, end_logits_ref,
                          start_pos_ref, end_pos_ref,
                          out_ref, acc_ref, *, seq_len, lane_slab, masked):
    BB, TS = start_logits_ref.shape          # static tile shape
    k = pl.program_id(1)                     # sequence-tile index ("arbitrary")

    @pl.when(k == 0)
    def _init():
        acc_ref[...] = jnp.ones_like(acc_ref)

    base = k * TS                                       # scalar tile offset
    s_pos = start_pos_ref[...] - base                   # (BB, 1) tile-local
    e_pos = end_pos_ref[...] - base                     # (BB, 1) tile-local
    rem = seq_len - base                                # scalar #valid lanes left

    # Hoisted per-slab local column index (lane iota), reused by every slab.
    local = jax.lax.broadcasted_iota(jnp.int32, (BB, lane_slab), 1)

    carry = None                                        # (BB, 128) running product
    for c in range(TS // lane_slab):
        off = c * lane_slab
        sl = start_logits_ref[:, off:off + lane_slab].astype(jnp.float32)
        el = end_logits_ref[:, off:off + lane_slab].astype(jnp.float32)

        # Shift stays on the (BB,1)/scalar side; no (BB, slab) int add.
        s_hit = local == (s_pos - off)
        e_hit = local == (e_pos - off)

        # sigmoid(x) = 0.5 + 0.5*tanh(x/2); complement 1-sigmoid(x) = 0.5 - 0.5*tanh(x/2)
        # -> one EUP tanh per logit, complement fused via a sign select.
        sh = 0.5 * jnp.tanh(0.5 * sl)
        eh = 0.5 * jnp.tanh(0.5 * el)
        t = (0.5 + jnp.where(s_hit, sh, -sh)) * (0.5 + jnp.where(e_hit, eh, -eh))

        if masked:
            # Neutralize padded / out-of-sequence lanes (garbage reads are
            # discarded by the select).
            t = jnp.where(local < (rem - off), t, 1.0)

        # Slab -> (BB, 128) product: lane-aligned 128-wide slices, tree reduce.
        parts = [t[:, j * 128:(j + 1) * 128] for j in range(lane_slab // 128)]
        while len(parts) > 1:
            nxt = [parts[i] * parts[i + 1] for i in range(0, len(parts) - 1, 2)]
            if len(parts) % 2:
                nxt.append(parts[-1])
            parts = nxt
        carry = parts[0] if carry is None else carry * parts[0]

    acc_ref[...] = acc_ref[...] * carry

    @pl.when(k == pl.num_programs(1) - 1)
    def _finalize():
        # 128 -> 1 lane product by repeated fold-in-half (exact; one-time cost).
        v = acc_ref[...]
        width = 128
        while width > 1:
            half = width // 2
            v = v[:, :half] * v[:, half:width]
            width = half
        tok = v * 10.0                                    # (BB, 1)
        diff = tok - 10.0
        blk_sum = jnp.sum(diff * diff, axis=0, keepdims=True)   # (1, 1)
        # Lane-dense output block: broadcast the block's partial sum over 128 lanes.
        out_ref[...] = jnp.broadcast_to(blk_sum, out_ref.shape)


def qa_fuzzy_logic_loss(start_logits, start_positions, end_logits, end_positions,
                        *, vmem_input_budget_bytes=16 * 1024 * 1024,
                        max_lane_tile=16384):
    """Pallas implementation of QuestionAnsweringNeuralFuzzyLogicLoss.forward."""
    start_logits = jnp.asarray(start_logits)   # f32 or bf16; no upcast in HBM
    end_logits = jnp.asarray(end_logits)
    B, S = start_logits.shape
    itemsize = jnp.dtype(start_logits.dtype).itemsize

    # Batch blocking: >=8-row blocks when divisible so v7x megacore can shard the
    # "parallel" batch axis; otherwise a single full-batch block (always legal
    # since the block then equals the full array dim).
    if B % 16 == 0:
        BB = max(8, B // 2)
    elif B % 8 == 0 and B > 8:
        BB = 8
    else:
        BB = B
    num_b_blocks = B // BB

    # Sequence (lane) tile from the VMEM budget: 2 logits inputs x 2 pipeline
    # buffers x BB rows x itemsize per lane.
    per_lane = 2 * 2 * BB * itemsize
    budget_ts = max(512, (vmem_input_budget_bytes // per_lane) // 512 * 512)
    ts_full = _round_up(S, 128)
    TS = ts_full if ts_full <= budget_ts else budget_ts
    TS = min(TS, max_lane_tile)
    TS = max(128, (TS // 128) * 128)
    lane_slab = 512 if TS % 512 == 0 else 128
    num_seq_blocks = pl.cdiv(S, TS)
    masked = (S % TS) != 0                     # statically drop mask when exact

    start_pos = jnp.asarray(start_positions, dtype=jnp.int32).reshape(B, 1)
    end_pos = jnp.asarray(end_positions, dtype=jnp.int32).reshape(B, 1)

    kernel = functools.partial(_qa_fuzzy_loss_kernel, seq_len=S,
                               lane_slab=lane_slab, masked=masked)

    out = pl.pallas_call(
        kernel,
        out_shape=jax.ShapeDtypeStruct((1, num_b_blocks * 128), jnp.float32),
        grid_spec=pltpu.PrefetchScalarGridSpec(
            num_scalar_prefetch=0,
            grid=(num_b_blocks, num_seq_blocks),
            in_specs=[
                pl.BlockSpec((BB, TS), lambda b, k: (b, k)),
                pl.BlockSpec((BB, TS), lambda b, k: (b, k)),
                pl.BlockSpec((BB, 1), lambda b, k: (b, 0)),
                pl.BlockSpec((BB, 1), lambda b, k: (b, 0)),
            ],
            out_specs=pl.BlockSpec((1, 128), lambda b, k: (0, b)),
            scratch_shapes=[pltpu.VMEM((BB, 128), jnp.float32)],
        ),
        # Batch axis is independent ("parallel", v7x megacore); sequence axis
        # carries the multiplicative accumulator -> "arbitrary".
        compiler_params=pltpu.CompilerParams(
            dimension_semantics=("parallel", "arbitrary"),
            vmem_limit_bytes=32 * 1024 * 1024),
    )(start_logits, end_logits, start_pos, end_pos)

    partial_sums = out.reshape(num_b_blocks, 128)[:, 0]
    return jnp.sum(partial_sums) / B


def _reference_loss(start_logits, start_positions, end_logits, end_positions):
    """Pure-JAX reference mirroring the PyTorch module exactly."""
    B, S = start_logits.shape
    s_oh = jax.nn.one_hot(start_positions, S, dtype=jnp.float32)
    e_oh = jax.nn.one_hot(end_positions, S, dtype=jnp.float32)
    sp = jax.nn.sigmoid(start_logits.astype(jnp.float32))
    ep = jax.nn.sigmoid(end_logits.astype(jnp.float32))
    si = jnp.where(s_oh == 0, 1.0 - sp, sp)
    ei = jnp.where(e_oh == 0, 1.0 - ep, ep)
    tok = jnp.prod(si * ei, axis=1) * 10.0
    verum = jnp.ones_like(tok) * 10.0
    return jnp.mean((tok - verum) ** 2)


def _check(loss, ref, name):
    loss = jax.block_until_ready(loss)
    assert jnp.allclose(loss, ref, rtol=1e-5, atol=1e-4), (name, loss, ref)


if __name__ == "__main__":
    key = jax.random.PRNGKey(0)
    keys = jax.random.split(key, 20)

    # 1) Primary small case consistent with the module: batch=2, seq=8.
    B, S = 2, 8
    sl = jax.random.normal(keys[0], (B, S), dtype=jnp.float32)
    el = jax.random.normal(keys[1], (B, S), dtype=jnp.float32)
    sp = jax.random.randint(keys[2], (B,), 0, S, dtype=jnp.int32)
    ep = jax.random.randint(keys[3], (B,), 0, S, dtype=jnp.int32)
    _check(qa_fuzzy_logic_loss(sl, sp, el, ep),
           _reference_loss(sl, sp, el, ep), "small")

    # 2) Non-multiple-of-128 sequence, multiple sequence tiles (exercises the
    #    validity mask and the multiplicative accumulator carry).
    B2, S2 = 4, 300
    sl2 = jax.random.normal(keys[4], (B2, S2), dtype=jnp.float32)
    el2 = jax.random.normal(keys[5], (B2, S2), dtype=jnp.float32)
    sp2 = jax.random.randint(keys[6], (B2,), 0, S2, dtype=jnp.int32)
    ep2 = jax.random.randint(keys[7], (B2,), 0, S2, dtype=jnp.int32)
    _check(qa_fuzzy_logic_loss(sl2, sp2, el2, ep2, max_lane_tile=128),
           _reference_loss(sl2, sp2, el2, ep2), "multi_seq_tile")

    # 3) Two batch blocks (parallel batch grid axis path).
    B3, S3 = 16, 200
    sl3 = jax.random.normal(keys[8], (B3, S3), dtype=jnp.float32)
    el3 = jax.random.normal(keys[9], (B3, S3), dtype=jnp.float32)
    sp3 = jax.random.randint(keys[10], (B3,), 0, S3, dtype=jnp.int32)
    ep3 = jax.random.randint(keys[11], (B3,), 0, S3, dtype=jnp.int32)
    _check(qa_fuzzy_logic_loss(sl3, sp3, el3, ep3),
           _reference_loss(sl3, sp3, el3, ep3), "multi_batch_block")

    # 4) 512-lane slab path (tile a multiple of 512, several slabs per tile).
    B4, S4 = 2, 1500
    sl4 = jax.random.normal(keys[12], (B4, S4), dtype=jnp.float32)
    el4 = jax.random.normal(keys[13], (B4, S4), dtype=jnp.float32)
    sp4 = jax.random.randint(keys[14], (B4,), 0, S4, dtype=jnp.int32)
    ep4 = jax.random.randint(keys[15], (B4,), 0, S4, dtype=jnp.int32)
    _check(qa_fuzzy_logic_loss(sl4, sp4, el4, ep4),
           _reference_loss(sl4, sp4, el4, ep4), "slab512")

    # 5) bf16 logits in HBM (no upcast before the pallas_call).
    sl5 = sl.astype(jnp.bfloat16)
    el5 = el.astype(jnp.bfloat16)
    _check(qa_fuzzy_logic_loss(sl5, sp, el5, ep),
           _reference_loss(sl5, sp, el5, ep), "bf16")

    print("KERNEL_OK")
</pallas_src>

<mosaic_0001>
module attributes {stable_mosaic.version = 11 : i64} {
  func.func @_qa_fuzzy_loss_kernel(%arg0: i32, %arg1: i32, %arg2: memref<2x128xf32, #tpu.memory_space<vmem>>, %arg3: memref<2x128xf32, #tpu.memory_space<vmem>>, %arg4: memref<2x1xi32, #tpu.memory_space<vmem>>, %arg5: memref<2x1xi32, #tpu.memory_space<vmem>>, %arg6: memref<1x128xf32, #tpu.memory_space<vmem>>, %arg7: memref<2x128xf32, #tpu.memory_space<vmem>>) attributes {dimension_semantics = [#tpu.dimension_semantics<parallel>, #tpu.dimension_semantics<arbitrary>], iteration_bounds = array<i64: 1, 1>, scalar_prefetch = 0 : i64, scratch_operands = 1 : i64, tpu.core_type = #tpu.core_type<tc>, window_params = [{transform_indices = @transform_0, window_bounds = array<i64: 2, 128>}, {transform_indices = @transform_1, window_bounds = array<i64: 2, 128>}, {transform_indices = @transform_2, window_bounds = array<i64: 2, 1>}, {transform_indices = @transform_3, window_bounds = array<i64: 2, 1>}, {transform_indices = @transform_4, window_bounds = array<i64: 1, 128>}]} {
    %c0_i32 = arith.constant 0 : i32
    %0 = arith.cmpi eq, %arg1, %c0_i32 : i32
    %1 = arith.extui %0 : i1 to i32
    %c0_i32_0 = arith.constant 0 : i32
    %2 = arith.cmpi ne, %1, %c0_i32_0 : i32
    scf.if %2 {
      %cst_25 = arith.constant 1.000000e+00 : f32
      %54 = vector.broadcast %cst_25 : f32 to vector<2x128xf32>
      %c0_26 = arith.constant 0 : index
      %c0_27 = arith.constant 0 : index
      %55 = vector.load %arg7[%c0_26, %c0_27] : memref<2x128xf32, #tpu.memory_space<vmem>>, vector<2x128xf32>
      tpu.vector_store %arg7[%c0_26, %c0_27], %54 {strides = array<i32>} : memref<2x128xf32, #tpu.memory_space<vmem>>, vector<2x128xf32>,
    } else {
    }
    %c128_i32 = arith.constant 128 : i32
    %3 = arith.muli %arg1, %c128_i32 : i32
    %c0 = arith.constant 0 : index
    %c0_1 = arith.constant 0 : index
    %4 = vector.load %arg4[%c0, %c0_1] : memref<2x1xi32, #tpu.memory_space<vmem>>, vector<2x1xi32>
    %5 = vector.broadcast %3 : i32 to vector<2x1xi32>
    %6 = arith.subi %4, %5 : vector<2x1xi32>
    %c0_2 = arith.constant 0 : index
    %c0_3 = arith.constant 0 : index
    %7 = vector.load %arg5[%c0_2, %c0_3] : memref<2x1xi32, #tpu.memory_space<vmem>>, vector<2x1xi32>
    %8 = vector.broadcast %3 : i32 to vector<2x1xi32>
    %9 = arith.subi %7, %8 : vector<2x1xi32>
    %c8_i32 = arith.constant 8 : i32
    %10 = arith.subi %c8_i32, %3 : i32
    %11 = tpu.iota {dimensions = array<i32: 1>} : vector<2x128xi32>
    %c0_4 = arith.constant 0 : index
    %c0_5 = arith.constant 0 : index
    %12 = vector.load %arg2[%c0_4, %c0_5] : memref<2x128xf32, #tpu.memory_space<vmem>>, vector<2x128xf32>
    %c0_6 = arith.constant 0 : index
    %c0_7 = arith.constant 0 : index
    %13 = vector.load %arg3[%c0_6, %c0_7] : memref<2x128xf32, #tpu.memory_space<vmem>>, vector<2x128xf32>
    %c0_i32_8 = arith.constant 0 : i32
    %14 = vector.broadcast %c0_i32_8 : i32 to vector<2x1xi32>
    %15 = arith.subi %6, %14 : vector<2x1xi32>
    %16 = vector.broadcast %15 : vector<2x1xi32> to vector<2x128xi32>
    %17 = arith.cmpi eq, %11, %16 : vector<2x128xi32>
    %c0_i32_9 = arith.constant 0 : i32
    %18 = vector.broadcast %c0_i32_9 : i32 to vector<2x1xi32>
    %19 = arith.subi %9, %18 : vector<2x1xi32>
    %20 = vector.broadcast %19 : vector<2x1xi32> to vector<2x128xi32>
    %21 = arith.cmpi eq, %11, %20 : vector<2x128xi32>
    %cst = arith.constant 5.000000e-01 : f32
    %22 = vector.broadcast %cst : f32 to vector<2x128xf32>
    %23 = arith.mulf %22, %12 : vector<2x128xf32>
    %24 = math.tanh %23 : vector<2x128xf32>
    %cst_10 = arith.constant 5.000000e-01 : f32
    %25 = vector.broadcast %cst_10 : f32 to vector<2x128xf32>
    %26 = arith.mulf %25, %24 : vector<2x128xf32>
    %cst_11 = arith.constant 5.000000e-01 : f32
    %27 = vector.broadcast %cst_11 : f32 to vector<2x128xf32>
    %28 = arith.mulf %27, %13 : vector<2x128xf32>
    %29 = math.tanh %28 : vector<2x128xf32>
    %cst_12 = arith.constant 5.000000e-01 : f32
    %30 = vector.broadcast %cst_12 : f32 to vector<2x128xf32>
    %31 = arith.mulf %30, %29 : vector<2x128xf32>
    %cst_13 = arith.constant 0.000000e+00 : f32
    %32 = vector.broadcast %cst_13 : f32 to vector<2x128xf32>
    %33 = arith.subf %32, %26 : vector<2x128xf32>
    %34 = arith.select %17, %26, %33 : vector<2x128xi1>, vector<2x128xf32>
    %cst_14 = arith.constant 5.000000e-01 : f32
    %35 = vector.broadcast %cst_14 : f32 to vector<2x128xf32>
    %36 = arith.addf %35, %34 : vector<2x128xf32>
    %cst_15 = arith.constant 0.000000e+00 : f32
    %37 = vector.broadcast %cst_15 : f32 to vector<2x128xf32>
    %38 = arith.subf %37, %31 : vector<2x128xf32>
    %39 = arith.select %21, %31, %38 : vector<2x128xi1>, vector<2x128xf32>
    %cst_16 = arith.constant 5.000000e-01 : f32
    %40 = vector.broadcast %cst_16 : f32 to vector<2x128xf32>
    %41 = arith.addf %40, %39 : vector<2x128xf32>
    %42 = arith.mulf %36, %41 : vector<2x128xf32>
    %c0_i32_17 = arith.constant 0 : i32
    %43 = arith.subi %10, %c0_i32_17 : i32
    %44 = vector.broadcast %43 : i32 to vector<2x128xi32>
    %45 = arith.cmpi slt, %11, %44 : vector<2x128xi32>
    %cst_18 = arith.constant 1.000000e+00 : f32
    %46 = vector.broadcast %cst_18 : f32 to vector<2x128xf32>
    %47 = arith.select %45, %42, %46 : vector<2x128xi1>, vector<2x128xf32>
    %c0_19 = arith.constant 0 : index
    %c0_20 = arith.constant 0 : index
    %48 = vector.load %arg7[%c0_19, %c0_20] : memref<2x128xf32, #tpu.memory_space<vmem>>, vector<2x128xf32>
    %49 = arith.mulf %48, %47 : vector<2x128xf32>
    %c0_21 = arith.constant 0 : index
    %c0_22 = arith.constant 0 : index
    %50 = vector.load %arg7[%c0_21, %c0_22] : memref<2x128xf32, #tpu.memory_space<vmem>>, vector<2x128xf32>
    tpu.vector_store %arg7[%c0_21, %c0_22], %49 {strides = array<i32>} : memref<2x128xf32, #tpu.memory_space<vmem>>, vector<2x128xf32>,
    %c0_i32_23 = arith.constant 0 : i32
    %51 = arith.cmpi eq, %arg1, %c0_i32_23 : i32
    %52 = arith.extui %51 : i1 to i32
    %c0_i32_24 = arith.constant 0 : i32
    %53 = arith.cmpi ne, %52, %c0_i32_24 : i32
    scf.if %53 {
      %c0_25 = arith.constant 0 : index
      %c0_26 = arith.constant 0 : index
      %54 = vector.load %arg7[%c0_25, %c0_26] : memref<2x128xf32, #tpu.memory_space<vmem>>, vector<2x128xf32>
      %55 = vector.extract_strided_slice %54 {offsets = [0, 0], sizes = [2, 64], strides = [1, 1]} : vector<2x128xf32> to vector<2x64xf32>
      %56 = vector.extract_strided_slice %54 {offsets = [0, 64], sizes = [2, 64], strides = [1, 1]} : vector<2x128xf32> to vector<2x64xf32>
      %57 = arith.mulf %55, %56 : vector<2x64xf32>
      %58 = vector.extract_strided_slice %57 {offsets = [0, 0], sizes = [2, 32], strides = [1, 1]} : vector<2x64xf32> to vector<2x32xf32>
      %59 = vector.extract_strided_slice %57 {offsets = [0, 32], sizes = [2, 32], strides = [1, 1]} : vector<2x64xf32> to vector<2x32xf32>
      %60 = arith.mulf %58, %59 : vector<2x32xf32>
      %61 = vector.extract_strided_slice %60 {offsets = [0, 0], sizes = [2, 16], strides = [1, 1]} : vector<2x32xf32> to vector<2x16xf32>
      %62 = vector.extract_strided_slice %60 {offsets = [0, 16], sizes = [2, 16], strides = [1, 1]} : vector<2x32xf32> to vector<2x16xf32>
      %63 = arith.mulf %61, %62 : vector<2x16xf32>
      %64 = vector.extract_strided_slice %63 {offsets = [0, 0], sizes = [2, 8], strides = [1, 1]} : vector<2x16xf32> to vector<2x8xf32>
      %65 = vector.extract_strided_slice %63 {offsets = [0, 8], sizes = [2, 8], strides = [1, 1]} : vector<2x16xf32> to vector<2x8xf32>
      %66 = arith.mulf %64, %65 : vector<2x8xf32>
      %67 = vector.extract_strided_slice %66 {offsets = [0, 0], sizes = [2, 4], strides = [1, 1]} : vector<2x8xf32> to vector<2x4xf32>
      %68 = vector.extract_strided_slice %66 {offsets = [0, 4], sizes = [2, 4], strides = [1, 1]} : vector<2x8xf32> to vector<2x4xf32>
      %69 = arith.mulf %67, %68 : vector<2x4xf32>
      %70 = vector.extract_strided_slice %69 {offsets = [0, 0], sizes = [2, 2], strides = [1, 1]} : vector<2x4xf32> to vector<2x2xf32>
      %71 = vector.extract_strided_slice %69 {offsets = [0, 2], sizes = [2, 2], strides = [1, 1]} : vector<2x4xf32> to vector<2x2xf32>
      %72 = arith.mulf %70, %71 : vector<2x2xf32>
      %73 = vector.extract_strided_slice %72 {offsets = [0, 0], sizes = [2, 1], strides = [1, 1]} : vector<2x2xf32> to vector<2x1xf32>
      %74 = vector.extract_strided_slice %72 {offsets = [0, 1], sizes = [2, 1], strides = [1, 1]} : vector<2x2xf32> to vector<2x1xf32>
      %75 = arith.mulf %73, %74 : vector<2x1xf32>
      %cst_27 = arith.constant 1.000000e+01 : f32
      %76 = vector.broadcast %cst_27 : f32 to vector<2x1xf32>
      %77 = arith.mulf %75, %76 : vector<2x1xf32>
      %cst_28 = arith.constant 1.000000e+01 : f32
      %78 = vector.broadcast %cst_28 : f32 to vector<2x1xf32>
      %79 = arith.subf %77, %78 : vector<2x1xf32>
      %80 = arith.mulf %79, %79 : vector<2x1xf32>
      %cst_29 = arith.constant dense<0.000000e+00> : vector<1xf32>
      %81 = vector.multi_reduction <add>, %80, %cst_29 [0] : vector<2x1xf32> to vector<1xf32>
      %82 = vector.shape_cast %81 : vector<1xf32> to vector<1x1xf32>
      %83 = vector.shape_cast %82 : vector<1x1xf32> to vector<1x1xf32>
      %84 = vector.broadcast %83 : vector<1x1xf32> to vector<1x128xf32>
      %c0_30 = arith.constant 0 : index
      %c0_31 = arith.constant 0 : index
      %85 = vector.load %arg6[%c0_30, %c0_31] : memref<1x128xf32, #tpu.memory_space<vmem>>, vector<1x128xf32>
      tpu.vector_store %arg6[%c0_30, %c0_31], %84 {strides = array<i32>} : memref<1x128xf32, #tpu.memory_space<vmem>>, vector<1x128xf32>,
    } else {
    }
    return
  }
  func.func @transform_0(%arg0: i32, %arg1: i32) -> (i32, i32) {
    %c0_i32 = arith.constant 0 : i32
    return %arg0, %arg1 : i32, i32
  }
  func.func @transform_1(%arg0: i32, %arg1: i32) -> (i32, i32) {
    %c0_i32 = arith.constant 0 : i32
    return %arg0, %arg1 : i32, i32
  }
  func.func @transform_2(%arg0: i32, %arg1: i32) -> (i32, i32) {
    %c0_i32 = arith.constant 0 : i32
    %c0_i32_0 = arith.constant 0 : i32
    return %arg0, %c0_i32 : i32, i32
  }
  func.func @transform_3(%arg0: i32, %arg1: i32) -> (i32, i32) {
    %c0_i32 = arith.constant 0 : i32
    %c0_i32_0 = arith.constant 0 : i32
    return %arg0, %c0_i32 : i32, i32
  }
  func.func @transform_4(%arg0: i32, %arg1: i32) -> (i32, i32) {
    %c0_i32 = arith.constant 0 : i32
    %c0_i32_0 = arith.constant 0 : i32
    return %c0_i32, %arg0 : i32, i32
  }
}

</mosaic_0001>

<bundles_post_ra>
// kernel: tpu_custom_call.1
= control target key start
LH: loop header
LB: loop body
LE: loop exit
PB: predicated region body
PF: predicated region fallthrough
CT: control target
= control target key end

     0   :  { %v175_v1 = vmov 0   ;;  %s225_s0 = inlined_call_operand.vmem [shape: f32[2,8], index: 0, kind: input, shape index: {}]   ;;  %s226_s1 = inlined_call_operand.vmem [shape: f32[2,8], index: 1, kind: input, shape index: {}]   ;;  %s227_s2 = inlined_call_operand.vmem [shape: s32[2,1], index: 2, kind: input, shape index: {}]   ;;  %s228_s3 = inlined_call_operand.vmem [shape: s32[2,1], index: 3, kind: input, shape index: {}]   ;;  %s229_s4 = inlined_call_operand.hbm [shape: f32[1,128], index: 4, kind: output, shape index: {}]  }
   0x1   :  { %v24_v0 = vld [vmem:[%s227_s2] sm:$0x3]  ;;  %144 = vset.pattern.permute.xlu0 %v175_v1 }
   0x2   :  { %9 = vsyncpa [#allocation4], 0  ;;  %35 = vperm.xlu0 %144, %v24_v0   ;;  %v27_v2 = vld [vmem:[%s228_s3] sm:$0x3]  ;;  %v176_v3 = vmov 1.0   ;;  %v30_v9 = vlaneseq  ;;  %s179_s2 = smov 112  }
   0x3   :  { %22 = vst [vmem:[#allocation2] sm:$0x3] %v176_v3  ;;  %v32_v4 = vld [vmem:[%s225_s0] sm:$0x3]  ;;  %s177_s0 = smov 64   ;;  %s180_s3 = smov 120  }
   0x4   :  { %v33_v5 = vld [vmem:[%s226_s1] sm:$0x3]  ;;  %v42_v6 = vmul.f32 0.5, %v32_v4  ;;  %v31_v13 = vand.u32 127, %v30_v9  ;;  %s178_s1 = smov 96   ;;  %s181_s23 = smov 124  }
   0x5   :  { %v45_v7 = vmul.f32 0.5, %v33_v5  ;;  %s182_s24 = smov 126   ;;  %s183_s25 = smov 127   ;;  %vm103_vm3 = vcmask 1024  }
   0x6   :  { %145 = vtanh.f32 %v42_v6  ;;  %vm56_vm2 = vcmp.lt.s32.totalorder %v31_v13, 8  ;;  %s184_s26 = smov [#allocation3]   ;;  %s124_s30 = sshll.u32 %s229_s4, 4  ;;  %s125_s30 = int_to_ptr.hbm [resolvable:$true] %s124_s30 }
   0x7   :  { %147 = vtanh.f32 %v45_v7  ;;  %s122_s27 = sshll.u32 %s184_s26, 4  ;;  %s123_s27 = int_to_ptr.vmem [resolvable:$true] %s122_s27 }
   0xa   :  { %39 = vperm.xlu0 %144, %v27_v2   ;;  %v58_v23 = vld [vmem:[#allocation2] sm:$0x3] }
   0xc   :  { %v146_v8 = vpop.eup %145 }
   0xd   :  { %v148_v10 = vpop.eup %147  ;;  %v44_v11 = vmul.f32 0.5, %v146_v8 }
   0xe   :  { %v47_v14 = vmul.f32 0.5, %v148_v10 }
   0xf   :  { %v48_v15 = vsub.f32 0.0, %v44_v11 }
  0x10   :  { %v51_v16 = vsub.f32 0.0, %v47_v14 }
  0x74   :  { %v36_v12 = vpop.permute.xlu0 %35 }
  0x75   :  { %vm37_vm0 = vcmp.eq.s32.totalorder %v31_v13, %v36_v12 }
  0x76   :  { %v49_v17 = vsel %vm37_vm0, %v44_v11, %v48_v15 }
  0x77   :  { %v50_v20 = vadd.f32 0.5, %v49_v17 }
  0x7c   :  { %v40_v18 = vpop.permute.xlu0 %39 }
  0x7d   :  { %vm41_vm1 = vcmp.eq.s32.totalorder %v31_v13, %v40_v18 }
  0x7e   :  { %v52_v19 = vsel %vm41_vm1, %v47_v14, %v51_v16 }
  0x7f   :  { %v53_v21 = vadd.f32 0.5, %v52_v19 }
  0x81   :  { %v54_v22 = vmul.f32 %v53_v21, %v50_v20 }
  0x83   :  { %v57_v24 = vsel %vm56_vm2, %v54_v22, 1.0 }
  0x84   :  { %v59_v25 = vmul.f32 %v58_v23, %v57_v24 }
  0x86   :  { %60 = vst [vmem:[#allocation2] sm:$0x3] %v59_v25 }
  0x8d   :  { %v64_v26 = vld [vmem:[#allocation2] sm:$0x3] }
  0x8e   :  { %66 = vrot.lane.b32.xlu1 %v64_v26, %s177_s0 }
 0x100   :  { %v67_v27 = vpop.permute.xlu1 %66 }
 0x101   :  { %v69_v28 = vmul.f32 %v67_v27, %v64_v26 }
 0x103   :  { %71 = vrot.lane.b32.xlu1 %v69_v28, %s178_s1 }
 0x175   :  { %v72_v29 = vpop.permute.xlu1 %71 }
 0x176   :  { %v74_v30 = vmul.f32 %v72_v29, %v69_v28 }
 0x178   :  { %76 = vrot.lane.b32.xlu2 %v74_v30, %s179_s2 }
 0x1d2   :  { %v77_v31 = vpop.permute.xlu2 %76 }
 0x1d3   :  { %v79_v32 = vmul.f32 %v77_v31, %v74_v30 }
 0x1d5   :  { %81 = vrot.lane.b32.xlu2 %v79_v32, %s180_s3 }
 0x22f   :  { %v82_v33 = vpop.permute.xlu2 %81 }
 0x230   :  { %v84_v34 = vmul.f32 %v82_v33, %v79_v32 }
 0x232   :  { %86 = vrot.lane.b32.xlu0 %v84_v34, %s181_s23 }
 0x2a4   :  { %v87_v35 = vpop.permute.xlu0 %86 }
 0x2a5   :  { %v89_v36 = vmul.f32 %v87_v35, %v84_v34 }
 0x2a7   :  { %91 = vrot.lane.b32.xlu1 %v89_v36, %s182_s24 }
 0x319   :  { %v92_v37 = vpop.permute.xlu1 %91 }
 0x31a   :  { %v94_v38 = vmul.f32 %v92_v37, %v89_v36 }
 0x31c   :  { %96 = vrot.lane.b32.xlu2 %v94_v38, %s183_s25 }
 0x376   :  { %v97_v39 = vpop.permute.xlu2 %96 }
 0x377   :  { %v99_v40 = vmul.f32 %v97_v39, %v94_v38 }
 0x379   :  { %v100_v41 = vmul.f32 10.0, %v99_v40 }
 0x37b   :  { %v133_v42 = vadd.f32 -10.0, %v100_v41 }
 0x37d   :  { %v102_v43 = vmul.f32 %v133_v42, %v133_v42 }
 0x37f   :  { %v104_v44 = vsel %vm103_vm3, %v102_v43, 0.0 }
 0x380   :  { %v105_v45 = vrot.slane %v104_v44, 4 }
 0x382   :  { %v106_v46 = vadd.f32 %v105_v45, %v104_v44 }
 0x384   :  { %v107_v47 = vrot.slane %v106_v46, 2 }
 0x386   :  { %v108_v48 = vadd.f32 %v107_v47, %v106_v46 }
 0x388   :  { %v109_v49 = vrot.slane %v108_v48, 1 }
 0x38a   :  { %v110_v50 = vadd.f32 %v109_v49, %v108_v48 }
 0x38c   :  { %113 = vperm.xlu0 %144, %v110_v50  }
 0x3fe   :  { %v114_v51 = vpop.permute.xlu0 %113 }
 0x3ff   :  { %116 = vst [vmem:[#allocation3] sm:$0x1] %v114_v51 }
 0x400   :  { %127 = dma.vmem_to_hbm [thread:$0]  %s123_s27, 16, %s125_s30, [#allocation4]  }
 0x401   :  { %173 = dma.done.wait [#allocation4], 16  }
 0x402   :  { %174 = vsyncadd [#allocation4], 4294967280 }
 0x403   :  { %132 = vsyncpa [#allocation4], 1 }

</bundles_post_ra>
